<compile_context>
chip_gen: v5e
topology: v5e:2x2
jax: 0.10.0
libtpu: 0.0.40
codegen_flags: <defaults>
</compile_context>

<pallas_src>
import jax
import jax.numpy as jnp
from jax import lax
from jax.experimental import pallas as pl
from jax.experimental.pallas import tpu as pltpu

IN_FEATS = 2 * 5 * 5      # 50
H1_FEATS = 6 * 4 * 4      # 96
H2_FEATS = 16 * 3 * 3     # 144
FC2_FEATS = 100
FC3_FEATS = 40
OUT_FEATS = 1
TILE_N = 4096             # batch columns (lanes) per grid step
SMALL_N = 512             # below this, a single block; megacore split not worth it


def meta_kernel(x_ref, w1_ref, b1_ref, w2_ref, b2_ref, w3_ref, b3_ref,
                w4_ref, b4_ref, w5_ref, b5_ref, out_ref):
    # Features on sublanes, batch on lanes.  Dots are bf16 x bf16 -> f32 accumulate;
    # bias + relu stay f32 (also sidesteps v5e's lack of bf16 VPU).
    h = jnp.dot(w1_ref[...], x_ref[...], preferred_element_type=jnp.float32)
    h = jnp.maximum(h + b1_ref[...], 0.0)                               # conv1+relu ( 96, T)
    h = jnp.dot(w2_ref[...], h.astype(jnp.bfloat16),
                preferred_element_type=jnp.float32)
    h = jnp.maximum(h + b2_ref[...], 0.0)                               # conv2+relu (144, T)
    h = jnp.dot(w3_ref[...], h.astype(jnp.bfloat16),
                preferred_element_type=jnp.float32)
    h = jnp.maximum(h + b3_ref[...], 0.0)                               # fc1+relu   (100, T)
    h = jnp.dot(w4_ref[...], h.astype(jnp.bfloat16),
                preferred_element_type=jnp.float32)
    h = jnp.maximum(h + b4_ref[...], 0.0)                               # fc2+relu   ( 40, T)
    # fc3 (40 -> 1) off the MXU: VPU multiply + sublane reduction -> lane-dense (1, T).
    out_ref[...] = (jnp.sum(h * w5_ref[...], axis=0, keepdims=True)
                    + b5_ref[...]).astype(out_ref.dtype)                # fc3        (  1, T)


def _conv_as_dense(w_oihw, in_chw):
    """Jacobian of a VALID stride-1 NCHW conv wrt the (C,H,W)-flattened input.
    Returns (Cin*H*W, Cout*Ho*Wo) so y_flat = x_flat @ M (PyTorch flatten order)."""
    cin, h, w = in_chw
    eye = jnp.eye(cin * h * w, dtype=jnp.float32).reshape(cin * h * w, cin, h, w)
    y = lax.conv_general_dilated(eye, w_oihw, (1, 1), 'VALID',
                                 dimension_numbers=('NCHW', 'OIHW', 'NCHW'))
    return y.reshape(cin * h * w, -1)


def prepare_params(params):
    """One-time weight packing/layout work — kept out of the per-call hot path.
    Weights are stored transposed (out_feats, in_feats) in bf16; biases as f32 columns."""
    (wc1, bc1, wc2, bc2, wf1, bf1, wf2, bf2, wf3, bf3) = params
    w1 = _conv_as_dense(wc1, (2, 5, 5)).T                 # (96, 50)
    b1 = jnp.repeat(bc1, 4 * 4).reshape(H1_FEATS, 1)      # bias in (C,H,W) flatten order
    w2 = _conv_as_dense(wc2, (6, 4, 4)).T                 # (144, 96)
    b2 = jnp.repeat(bc2, 3 * 3).reshape(H2_FEATS, 1)
    w3 = wf1                                              # (100, 144)  PyTorch (out,in) = W^T
    b3 = bf1.reshape(FC2_FEATS, 1)
    w4 = wf2                                              # (40, 100)
    b4 = bf2.reshape(FC3_FEATS, 1)
    w5 = wf3.reshape(FC3_FEATS, 1)                        # (40, 1) column, stays f32 (VPU)
    b5 = bf3.reshape(1, 1)
    w1, w2, w3, w4 = (jnp.asarray(w, jnp.bfloat16) for w in (w1, w2, w3, w4))
    b1, b2, b3, b4, w5, b5 = (jnp.asarray(b, jnp.float32)
                              for b in (b1, b2, b3, b4, w5, b5))
    return (w1, b1, w2, b2, w3, b3, w4, b4, w5, b5)


def _round_up(a, m):
    return -(-a // m) * m


@jax.jit
def meta_forward(x_nchw, prepared):
    """x_nchw: (N, 2, 5, 5) float32 (PyTorch layout); prepared = prepare_params(...)."""
    n = x_nchw.shape[0]
    # NCHW -> (N, 50) is a free contiguous view; the bf16 cast + transpose to
    # batch-on-lanes (and any small zero pad) fuse into one tiny copy.
    x_t = x_nchw.reshape(n, IN_FEATS).astype(jnp.bfloat16).T          # (50, N)

    if n <= SMALL_N:
        steps, tile = 1, n                      # single block == full array dims
    else:
        steps = max(2, pl.cdiv(n, TILE_N))      # >=2 steps so both v7x TCs get work
        tile = _round_up(pl.cdiv(n, steps), 128)
    n_pad = steps * tile
    if n_pad != n:
        x_t = jnp.pad(x_t, ((0, 0), (0, n_pad - n)))   # <= steps*128 extra zero columns

    w_specs = [pl.BlockSpec(p.shape, lambda i: (0, 0)) for p in prepared]
    flops = 2 * n_pad * (IN_FEATS * H1_FEATS + H1_FEATS * H2_FEATS
                         + H2_FEATS * FC2_FEATS + FC2_FEATS * FC3_FEATS
                         + FC3_FEATS * OUT_FEATS)
    bytes_accessed = (2 * IN_FEATS * n_pad + 4 * OUT_FEATS * n_pad
                      + sum(int(p.size) * p.dtype.itemsize for p in prepared))

    out = pl.pallas_call(
        meta_kernel,
        out_shape=jax.ShapeDtypeStruct((OUT_FEATS, n_pad), jnp.float32),
        grid=(steps,),
        in_specs=[pl.BlockSpec((IN_FEATS, tile), lambda i: (0, i))] + w_specs,
        out_specs=pl.BlockSpec((OUT_FEATS, tile), lambda i: (0, i)),   # lane-dense output
        compiler_params=pltpu.CompilerParams(
            dimension_semantics=("parallel",),
            vmem_limit_bytes=48 * 1024 * 1024),   # peak use ~16 MB; safe on v7x's 64 MiB
        cost_estimate=pl.CostEstimate(flops=flops, transcendentals=0,
                                      bytes_accessed=bytes_accessed),
    )(x_t, *prepared)
    return out[0, :n].reshape(n, 1)


def ref_forward(x_nchw, params):
    """Pure-JAX reference mirroring the PyTorch forward exactly (NCHW, f32)."""
    (wc1, bc1, wc2, bc2, wf1, bf1, wf2, bf2, wf3, bf3) = params
    dn = ('NCHW', 'OIHW', 'NCHW')
    y = lax.conv_general_dilated(x_nchw, wc1, (1, 1), 'VALID', dimension_numbers=dn)
    y = jnp.maximum(y + bc1[None, :, None, None], 0.0)
    y = lax.conv_general_dilated(y, wc2, (1, 1), 'VALID', dimension_numbers=dn)
    y = jnp.maximum(y + bc2[None, :, None, None], 0.0)
    flat = y.reshape(y.shape[0], -1)                      # (C,H,W) flatten order
    f1 = jnp.maximum(flat @ wf1.T + bf1, 0.0)
    f2 = jnp.maximum(f1 @ wf2.T + bf2, 0.0)
    return f2 @ wf3.T + bf3


def init_params(key):
    """Deterministic PyTorch-default-style init (uniform +/- 1/sqrt(fan_in))."""
    ks = jax.random.split(key, 10)

    def u(k, shape, fan_in):
        b = 1.0 / jnp.sqrt(jnp.float32(fan_in))
        return jax.random.uniform(k, shape, jnp.float32, -b, b)

    wc1 = u(ks[0], (6, 2, 2, 2), 2 * 2 * 2)
    bc1 = u(ks[1], (6,), 2 * 2 * 2)
    wc2 = u(ks[2], (16, 6, 2, 2), 6 * 2 * 2)
    bc2 = u(ks[3], (16,), 6 * 2 * 2)
    wf1 = u(ks[4], (100, 144), 144)
    bf1 = u(ks[5], (100,), 144)
    wf2 = u(ks[6], (40, 100), 100)
    bf2 = u(ks[7], (40,), 100)
    wf3 = u(ks[8], (1, 40), 40)
    bf3 = u(ks[9], (1,), 40)
    return (wc1, bc1, wc2, bc2, wf1, bf1, wf2, bf2, wf3, bf3)


if __name__ == "__main__":
    key = jax.random.PRNGKey(0)
    k_x, k_p, k_x2, k_x3 = jax.random.split(key, 4)

    params = init_params(k_p)
    prepared = prepare_params(params)          # one-time packing, outside the hot path

    # Tolerance reflects the bf16 weight/activation operands (the f32 reference differs
    # by ~bf16 rounding per layer); structural errors would be orders of magnitude larger.
    RTOL = ATOL = 2e-2

    # Small case implied by the module (fc1 expects 16*3*3 => 5x5 spatial, Cin=2).
    x = jax.random.normal(k_x, (2, 2, 5, 5), jnp.float32)
    out = jax.block_until_ready(meta_forward(x, prepared))
    ref = ref_forward(x, params)
    assert out.shape == (2, 1)
    assert jnp.allclose(out, ref, rtol=RTOL, atol=ATOL), (out, ref)

    # Medium batch: exercises the forced >=2-step (v7x megacore) path + lane padding.
    x_med = jax.random.normal(k_x3, (900, 2, 5, 5), jnp.float32)
    out_med = jax.block_until_ready(meta_forward(x_med, prepared))
    ref_med = ref_forward(x_med, params)
    assert out_med.shape == (900, 1)
    assert jnp.allclose(out_med, ref_med, rtol=RTOL, atol=ATOL)

    # Large batch: exercises the multi-tile grid with a non-divisible remainder.
    x_big = jax.random.normal(k_x2, (2 * TILE_N + 7, 2, 5, 5), jnp.float32)
    out_big = jax.block_until_ready(meta_forward(x_big, prepared))
    ref_big = ref_forward(x_big, params)
    assert out_big.shape == (2 * TILE_N + 7, 1)
    assert jnp.allclose(out_big, ref_big, rtol=RTOL, atol=ATOL)

    print("KERNEL_OK")
</pallas_src>

<mosaic_0001>
module attributes {stable_mosaic.version = 11 : i64} {
  func.func @meta_kernel(%arg0: i32, %arg1: memref<50x2xbf16, #tpu.memory_space<vmem>>, %arg2: memref<96x50xbf16, #tpu.memory_space<vmem>>, %arg3: memref<96x1xf32, #tpu.memory_space<vmem>>, %arg4: memref<144x96xbf16, #tpu.memory_space<vmem>>, %arg5: memref<144x1xf32, #tpu.memory_space<vmem>>, %arg6: memref<100x144xbf16, #tpu.memory_space<vmem>>, %arg7: memref<100x1xf32, #tpu.memory_space<vmem>>, %arg8: memref<40x100xbf16, #tpu.memory_space<vmem>>, %arg9: memref<40x1xf32, #tpu.memory_space<vmem>>, %arg10: memref<40x1xf32, #tpu.memory_space<vmem>>, %arg11: memref<1x1xf32, #tpu.memory_space<vmem>>, %arg12: memref<1x2xf32, #tpu.memory_space<vmem>>) attributes {dimension_semantics = [#tpu.dimension_semantics<parallel>], iteration_bounds = array<i64: 1>, scalar_prefetch = 0 : i64, scratch_operands = 0 : i64, tpu.core_type = #tpu.core_type<tc>, window_params = [{transform_indices = @transform_0, window_bounds = array<i64: 50, 2>}, {pipeline_mode = #tpu.pipeline_mode<synchronous>, transform_indices = @transform_1, window_bounds = array<i64: 96, 50>}, {pipeline_mode = #tpu.pipeline_mode<synchronous>, transform_indices = @transform_2, window_bounds = array<i64: 96, 1>}, {pipeline_mode = #tpu.pipeline_mode<synchronous>, transform_indices = @transform_3, window_bounds = array<i64: 144, 96>}, {pipeline_mode = #tpu.pipeline_mode<synchronous>, transform_indices = @transform_4, window_bounds = array<i64: 144, 1>}, {pipeline_mode = #tpu.pipeline_mode<synchronous>, transform_indices = @transform_5, window_bounds = array<i64: 100, 144>}, {pipeline_mode = #tpu.pipeline_mode<synchronous>, transform_indices = @transform_6, window_bounds = array<i64: 100, 1>}, {pipeline_mode = #tpu.pipeline_mode<synchronous>, transform_indices = @transform_7, window_bounds = array<i64: 40, 100>}, {pipeline_mode = #tpu.pipeline_mode<synchronous>, transform_indices = @transform_8, window_bounds = array<i64: 40, 1>}, {pipeline_mode = #tpu.pipeline_mode<synchronous>, transform_indices = @transform_9, window_bounds = array<i64: 40, 1>}, {pipeline_mode = #tpu.pipeline_mode<synchronous>, transform_indices = @transform_10, window_bounds = array<i64: 1, 1>}, {transform_indices = @transform_11, window_bounds = array<i64: 1, 2>}]} {
    %c0 = arith.constant 0 : index
    %c0_0 = arith.constant 0 : index
    %0 = vector.load %arg2[%c0, %c0_0] : memref<96x50xbf16, #tpu.memory_space<vmem>>, vector<96x50xbf16>
    %c0_1 = arith.constant 0 : index
    %c0_2 = arith.constant 0 : index
    %1 = vector.load %arg1[%c0_1, %c0_2] : memref<50x2xbf16, #tpu.memory_space<vmem>>, vector<50x2xbf16>
    %cst = arith.constant dense<0.000000e+00> : vector<96x2xf32>
    %2 = tpu.matmul %0, %1, %cst {dimension_numbers = #tpu.dot_dimension_numbers<[1], [0], [0], [1], [0, 0, 1, 1], [], []>} : vector<96x50xbf16>, vector<50x2xbf16>, vector<96x2xf32> -> vector<96x2xf32>
    %c0_3 = arith.constant 0 : index
    %c0_4 = arith.constant 0 : index
    %3 = vector.load %arg3[%c0_3, %c0_4] : memref<96x1xf32, #tpu.memory_space<vmem>>, vector<96x1xf32>
    %4 = vector.broadcast %3 : vector<96x1xf32> to vector<96x2xf32>
    %5 = arith.addf %2, %4 : vector<96x2xf32>
    %cst_5 = arith.constant 0.000000e+00 : f32
    %6 = vector.broadcast %cst_5 : f32 to vector<96x2xf32>
    %7 = arith.maximumf %5, %6 : vector<96x2xf32>
    %c0_6 = arith.constant 0 : index
    %c0_7 = arith.constant 0 : index
    %8 = vector.load %arg4[%c0_6, %c0_7] : memref<144x96xbf16, #tpu.memory_space<vmem>>, vector<144x96xbf16>
    %9 = arith.truncf %7 : vector<96x2xf32> to vector<96x2xbf16>
    %cst_8 = arith.constant dense<0.000000e+00> : vector<144x2xf32>
    %10 = tpu.matmul %8, %9, %cst_8 {dimension_numbers = #tpu.dot_dimension_numbers<[1], [0], [0], [1], [0, 0, 1, 1], [], []>} : vector<144x96xbf16>, vector<96x2xbf16>, vector<144x2xf32> -> vector<144x2xf32>
    %c0_9 = arith.constant 0 : index
    %c0_10 = arith.constant 0 : index
    %11 = vector.load %arg5[%c0_9, %c0_10] : memref<144x1xf32, #tpu.memory_space<vmem>>, vector<144x1xf32>
    %12 = vector.broadcast %11 : vector<144x1xf32> to vector<144x2xf32>
    %13 = arith.addf %10, %12 : vector<144x2xf32>
    %cst_11 = arith.constant 0.000000e+00 : f32
    %14 = vector.broadcast %cst_11 : f32 to vector<144x2xf32>
    %15 = arith.maximumf %13, %14 : vector<144x2xf32>
    %c0_12 = arith.constant 0 : index
    %c0_13 = arith.constant 0 : index
    %16 = vector.load %arg6[%c0_12, %c0_13] : memref<100x144xbf16, #tpu.memory_space<vmem>>, vector<100x144xbf16>
    %17 = arith.truncf %15 : vector<144x2xf32> to vector<144x2xbf16>
    %cst_14 = arith.constant dense<0.000000e+00> : vector<100x2xf32>
    %18 = tpu.matmul %16, %17, %cst_14 {dimension_numbers = #tpu.dot_dimension_numbers<[1], [0], [0], [1], [0, 0, 1, 1], [], []>} : vector<100x144xbf16>, vector<144x2xbf16>, vector<100x2xf32> -> vector<100x2xf32>
    %c0_15 = arith.constant 0 : index
    %c0_16 = arith.constant 0 : index
    %19 = vector.load %arg7[%c0_15, %c0_16] : memref<100x1xf32, #tpu.memory_space<vmem>>, vector<100x1xf32>
    %20 = vector.broadcast %19 : vector<100x1xf32> to vector<100x2xf32>
    %21 = arith.addf %18, %20 : vector<100x2xf32>
    %cst_17 = arith.constant 0.000000e+00 : f32
    %22 = vector.broadcast %cst_17 : f32 to vector<100x2xf32>
    %23 = arith.maximumf %21, %22 : vector<100x2xf32>
    %c0_18 = arith.constant 0 : index
    %c0_19 = arith.constant 0 : index
    %24 = vector.load %arg8[%c0_18, %c0_19] : memref<40x100xbf16, #tpu.memory_space<vmem>>, vector<40x100xbf16>
    %25 = arith.truncf %23 : vector<100x2xf32> to vector<100x2xbf16>
    %cst_20 = arith.constant dense<0.000000e+00> : vector<40x2xf32>
    %26 = tpu.matmul %24, %25, %cst_20 {dimension_numbers = #tpu.dot_dimension_numbers<[1], [0], [0], [1], [0, 0, 1, 1], [], []>} : vector<40x100xbf16>, vector<100x2xbf16>, vector<40x2xf32> -> vector<40x2xf32>
    %c0_21 = arith.constant 0 : index
    %c0_22 = arith.constant 0 : index
    %27 = vector.load %arg9[%c0_21, %c0_22] : memref<40x1xf32, #tpu.memory_space<vmem>>, vector<40x1xf32>
    %28 = vector.broadcast %27 : vector<40x1xf32> to vector<40x2xf32>
    %29 = arith.addf %26, %28 : vector<40x2xf32>
    %cst_23 = arith.constant 0.000000e+00 : f32
    %30 = vector.broadcast %cst_23 : f32 to vector<40x2xf32>
    %31 = arith.maximumf %29, %30 : vector<40x2xf32>
    %c0_24 = arith.constant 0 : index
    %c0_25 = arith.constant 0 : index
    %32 = vector.load %arg10[%c0_24, %c0_25] : memref<40x1xf32, #tpu.memory_space<vmem>>, vector<40x1xf32>
    %33 = vector.broadcast %32 : vector<40x1xf32> to vector<40x2xf32>
    %34 = arith.mulf %31, %33 : vector<40x2xf32>
    %cst_26 = arith.constant dense<0.000000e+00> : vector<2xf32>
    %35 = vector.multi_reduction <add>, %34, %cst_26 [0] : vector<40x2xf32> to vector<2xf32>
    %36 = vector.shape_cast %35 : vector<2xf32> to vector<1x2xf32>
    %c0_27 = arith.constant 0 : index
    %c0_28 = arith.constant 0 : index
    %37 = vector.load %arg11[%c0_27, %c0_28] : memref<1x1xf32, #tpu.memory_space<vmem>>, vector<1x1xf32>
    %38 = vector.broadcast %37 : vector<1x1xf32> to vector<1x2xf32>
    %39 = arith.addf %36, %38 : vector<1x2xf32>
    %c0_29 = arith.constant 0 : index
    %c0_30 = arith.constant 0 : index
    %40 = vector.load %arg12[%c0_29, %c0_30] : memref<1x2xf32, #tpu.memory_space<vmem>>, vector<1x2xf32>
    tpu.vector_store %arg12[%c0_29, %c0_30], %39 {strides = array<i32>} : memref<1x2xf32, #tpu.memory_space<vmem>>, vector<1x2xf32>,
    return
  }
  func.func @transform_0(%arg0: i32) -> (i32, i32) {
    %c0_i32 = arith.constant 0 : i32
    %c0_i32_0 = arith.constant 0 : i32
    return %c0_i32, %arg0 : i32, i32
  }
  func.func @transform_1(%arg0: i32) -> (i32, i32) {
    %c0_i32 = arith.constant 0 : i32
    %c0_i32_0 = arith.constant 0 : i32
    %c0_i32_1 = arith.constant 0 : i32
    return %c0_i32, %c0_i32_0 : i32, i32
  }
  func.func @transform_2(%arg0: i32) -> (i32, i32) {
    %c0_i32 = arith.constant 0 : i32
    %c0_i32_0 = arith.constant 0 : i32
    %c0_i32_1 = arith.constant 0 : i32
    return %c0_i32, %c0_i32_0 : i32, i32
  }
  func.func @transform_3(%arg0: i32) -> (i32, i32) {
    %c0_i32 = arith.constant 0 : i32
    %c0_i32_0 = arith.constant 0 : i32
    %c0_i32_1 = arith.constant 0 : i32
    return %c0_i32, %c0_i32_0 : i32, i32
  }
  func.func @transform_4(%arg0: i32) -> (i32, i32) {
    %c0_i32 = arith.constant 0 : i32
    %c0_i32_0 = arith.constant 0 : i32
    %c0_i32_1 = arith.constant 0 : i32
    return %c0_i32, %c0_i32_0 : i32, i32
  }
  func.func @transform_5(%arg0: i32) -> (i32, i32) {
    %c0_i32 = arith.constant 0 : i32
    %c0_i32_0 = arith.constant 0 : i32
    %c0_i32_1 = arith.constant 0 : i32
    return %c0_i32, %c0_i32_0 : i32, i32
  }
  func.func @transform_6(%arg0: i32) -> (i32, i32) {
    %c0_i32 = arith.constant 0 : i32
    %c0_i32_0 = arith.constant 0 : i32
    %c0_i32_1 = arith.constant 0 : i32
    return %c0_i32, %c0_i32_0 : i32, i32
  }
  func.func @transform_7(%arg0: i32) -> (i32, i32) {
    %c0_i32 = arith.constant 0 : i32
    %c0_i32_0 = arith.constant 0 : i32
    %c0_i32_1 = arith.constant 0 : i32
    return %c0_i32, %c0_i32_0 : i32, i32
  }
  func.func @transform_8(%arg0: i32) -> (i32, i32) {
    %c0_i32 = arith.constant 0 : i32
    %c0_i32_0 = arith.constant 0 : i32
    %c0_i32_1 = arith.constant 0 : i32
    return %c0_i32, %c0_i32_0 : i32, i32
  }
  func.func @transform_9(%arg0: i32) -> (i32, i32) {
    %c0_i32 = arith.constant 0 : i32
    %c0_i32_0 = arith.constant 0 : i32
    %c0_i32_1 = arith.constant 0 : i32
    return %c0_i32, %c0_i32_0 : i32, i32
  }
  func.func @transform_10(%arg0: i32) -> (i32, i32) {
    %c0_i32 = arith.constant 0 : i32
    %c0_i32_0 = arith.constant 0 : i32
    %c0_i32_1 = arith.constant 0 : i32
    return %c0_i32, %c0_i32_0 : i32, i32
  }
  func.func @transform_11(%arg0: i32) -> (i32, i32) {
    %c0_i32 = arith.constant 0 : i32
    %c0_i32_0 = arith.constant 0 : i32
    return %c0_i32, %arg0 : i32, i32
  }
}

</mosaic_0001>

<bundles_post_ra>
// kernel: meta_forward.1
= control target key start
LH: loop header
LB: loop body
LE: loop exit
PB: predicated region body
PF: predicated region fallthrough
CT: control target
= control target key end

     0   :  { %s1641_s0 = inlined_call_operand.vmem [shape: bf16[50,2], index: 0, kind: input, shape index: {}]   ;;  %s1642_s1 = inlined_call_operand.vmem [shape: bf16[96,50], index: 1, kind: input, shape index: {}]   ;;  %s1643_s2 = inlined_call_operand.vmem [shape: f32[96,1], index: 2, kind: input, shape index: {}]   ;;  %s1644_s3 = inlined_call_operand.vmem [shape: bf16[144,96], index: 3, kind: input, shape index: {}]   ;;  %s1645_s4 = inlined_call_operand.vmem [shape: f32[144,1], index: 4, kind: input, shape index: {}]   ;;  %s1646_s5 = inlined_call_operand.vmem [shape: bf16[100,144], index: 5, kind: input, shape index: {}]   ;;  %s1647_s6 = inlined_call_operand.vmem [shape: f32[100,1], index: 6, kind: input, shape index: {}]   ;;  %s1648_s7 = inlined_call_operand.vmem [shape: bf16[40,100], index: 7, kind: input, shape index: {}]   ;;  %s1649_s8 = inlined_call_operand.vmem [shape: f32[40,1], index: 8, kind: input, shape index: {}]   ;;  %s1650_s9 = inlined_call_operand.vmem [shape: f32[40,1], index: 9, kind: input, shape index: {}]   ;;  %s1651_s10 = inlined_call_operand.<no memory space> [shape: f32[1,1], index: 10, kind: input, shape index: {}]   ;;  %s1652_s11 = inlined_call_operand.hbm [shape: f32[1,2], index: 11, kind: output, shape index: {}]  }
   0x1   :  { %v16_v0 = vstv %s1651_s10 }
   0x2   :  { %17 = vst [vmem:[#allocation2] sm:$0x1] %v16_v0 }
   0x3   :  { %v71_v1 = vld [vmem:[%s1643_s2 + $0x50] sm:$0xff]  ;;  %v69_v2 = vld [vmem:[%s1643_s2 + $0x40] sm:$0xff]  ;;  %v1212_v3 = vmov 0   ;;  %v60_v5 = vld [vmem:[%s1641_s0 + $0x18] sm:$0x1]  ;;  %vm203_vm0 = vcmask 1040384  }
   0x4   :  { %1184 = vset.pattern.permute.xlu1 %v1212_v3  ;;  %1183 = vset.pattern.permute.xlu0 %v1212_v3  ;;  %v67_v4 = vld [vmem:[%s1643_s2 + $0x30] sm:$0xff]  ;;  %v176_v6 = vunpack.c.l.b16 %v60_v5  ;;  %v72_v9 = vld [vmem:[%s1643_s2 + $0x58] sm:$0xff]  ;;  %v70_v10 = vld [vmem:[%s1643_s2 + $0x48] sm:$0xff] }
   0x5   :  { %125 = vperm.xlu0 %1183, %v71_v1   ;;  %115 = vperm.xlu1 %1184, %v69_v2   ;;  %v1151_v11 = vld [vmem:[%s1641_s0 + $0x10] sm:$0xff] }
   0x6   :  { %1185 = vset.pattern.permute.xlu2 %v1212_v3  ;;  %v180_v7 = vpack.c.b16 %v176_v6, %v176_v6 }
   0x7   :  { %105 = vperm.xlu2 %1185, %v67_v4  }
   0x8   :  { %v205_v8 = vsel %vm203_vm0, %v180_v7, 0 }
   0x9   :  { %211 = vmatpush.bf16.msra.mxu0 %v205_v8 }
   0xa   :  { %18 = vsyncpa [#allocation4], 0  ;;  %v68_v12 = vld [vmem:[%s1643_s2 + $0x38] sm:$0xff]  ;;  %v1150_v13 = vld [vmem:[%s1641_s0 + $0x8] sm:$0xff]  ;;  %vm184_vm1 = vcmask 408576   ;;  %vm435_vm2 = vcmask 785408  }
   0xb   :  { %v66_v14 = vld [vmem:[%s1643_s2 + $0x28] sm:$0xff]  ;;  %v65_v15 = vld [vmem:[%s1643_s2 + $0x20] sm:$0xff]  ;;  %v63_v17 = vld [vmem:[%s1643_s2 + $0x10] sm:$0xff]  ;;  %vm695_vm3 = vcmask 130048   ;;  %vm881_vm4 = vcmask 1041408   ;;  %vm871_vm5 = vcmask 818176  }
   0xc   :  { %v1149_v16 = vld [vmem:[%s1641_s0] sm:$0xff]  ;;  %v64_v19 = vld [vmem:[%s1643_s2 + $0x18] sm:$0xff]  ;;  %v62_v21 = vld [vmem:[%s1643_s2 + $0x8] sm:$0xff]  ;;  %vm948_vm6 = vcmask 15360   ;;  %s981_s25 = sshll.u32 %s1652_s11, 4  ;;  %vm972_vm7 = vcmask 8192   ;;  %s982_s25 = int_to_ptr.hbm [resolvable:$true] %s981_s25 }
   0xd   :  { %130 = vperm.xlu0 %1183, %v72_v9   ;;  %120 = vperm.xlu1 %1184, %v70_v10   ;;  %v1143_v18 = vld [vmem:[%s1642_s1] sm:$0xff]  ;;  %v296_v22 = vld [vmem:[%s1645_s4 + $0x70] sm:$0xff]  ;;  %v297_v23 = vld [vmem:[%s1645_s4 + $0x78] sm:$0xff] }
   0xe   :  { %212 = vmatpush.bf16.msra.mxu0 %v1151_v11  ;;  %v61_v20 = vld [vmem:[%s1643_s2] sm:$0xff]  ;;  %v1144_v25 = vld [vmem:[%s1642_s1 + $0x8] sm:$0xff]  ;;  %v292_v27 = vld [vmem:[%s1645_s4 + $0x50] sm:$0xff] }
   0xf   :  { %110 = vperm.xlu2 %1185, %v68_v12   ;;  %v294_v24 = vld [vmem:[%s1645_s4 + $0x60] sm:$0xff]  ;;  %v295_v26 = vld [vmem:[%s1645_s4 + $0x68] sm:$0xff]  ;;  %v293_v28 = vld [vmem:[%s1645_s4 + $0x58] sm:$0xff] }
  0x10   :  { %v290_v29 = vld [vmem:[%s1645_s4 + $0x40] sm:$0xff]  ;;  %v291_v30 = vld [vmem:[%s1645_s4 + $0x48] sm:$0xff]  ;;  %v288_v31 = vld [vmem:[%s1645_s4 + $0x30] sm:$0xff] }
  0x11   :  { %v1145_v32 = vld [vmem:[%s1642_s1 + $0x10] sm:$0xff]  ;;  %v289_v33 = vld [vmem:[%s1645_s4 + $0x38] sm:$0xff]  ;;  %v286_v34 = vld [vmem:[%s1645_s4 + $0x20] sm:$0xff] }
  0x12   :  { %213 = vmatpush.bf16.msra.mxu0 %v1150_v13  ;;  %v287_v35 = vld [vmem:[%s1645_s4 + $0x28] sm:$0xff]  ;;  %v284_v36 = vld [vmem:[%s1645_s4 + $0x10] sm:$0xff]  ;;  %v285_v37 = vld [vmem:[%s1645_s4 + $0x18] sm:$0xff] }
  0x13   :  { %v282_v38 = vld [vmem:[%s1645_s4] sm:$0xff]  ;;  %v1146_v39 = vld [vmem:[%s1642_s1 + $0x18] sm:$0xff]  ;;  %v283_v40 = vld [vmem:[%s1645_s4 + $0x8] sm:$0xff] }
  0x14   :  { %v298_v41 = vld [vmem:[%s1645_s4 + $0x80] sm:$0xff]  ;;  %v299_v42 = vld [vmem:[%s1645_s4 + $0x88] sm:$0xff]  ;;  %v567_v44 = vld [vmem:[%s1647_s6 + $0x50] sm:$0xff] }
  0x15   :  { %100 = vperm.xlu1 %1184, %v66_v14   ;;  %95 = vperm.xlu0 %1183, %v65_v15   ;;  %v569_v43 = vld [vmem:[%s1647_s6 + $0x60] sm:$0xf]  ;;  %v568_v45 = vld [vmem:[%s1647_s6 + $0x58] sm:$0xff]  ;;  %v566_v48 = vld [vmem:[%s1647_s6 + $0x48] sm:$0xff] }
  0x16   :  { %214 = vmatpush.bf16.msra.mxu0 %v1149_v16  ;;  %v1147_v46 = vld [vmem:[%s1642_s1 + $0x20] sm:$0xff]  ;;  %v563_v49 = vld [vmem:[%s1647_s6 + $0x30] sm:$0xff]  ;;  %v564_v50 = vld [vmem:[%s1647_s6 + $0x38] sm:$0xff] }
  0x17   :  { %85 = vperm.xlu2 %1185, %v63_v17   ;;  %v565_v47 = vld [vmem:[%s1647_s6 + $0x40] sm:$0xff]  ;;  %v562_v52 = vld [vmem:[%s1647_s6 + $0x28] sm:$0xff]  ;;  %v559_v54 = vld [vmem:[%s1647_s6 + $0x10] sm:$0xff] }
  0x18   :  { %v561_v51 = vld [vmem:[%s1647_s6 + $0x20] sm:$0xff]  ;;  %v1148_v53 = vld [vmem:[%s1642_s1 + $0x28] sm:$0xff]  ;;  %v560_v55 = vld [vmem:[%s1647_s6 + $0x18] sm:$0xff] }
  0x19   :  { %1026 = vmatmul.msk.bf16.vlgmr.msra.gmra.mxu0 %vm184_vm1, %v1143_v18  ;;  %v557_v56 = vld [vmem:[%s1647_s6] sm:$0xff]  ;;  %v558_v57 = vld [vmem:[%s1647_s6 + $0x8] sm:$0xff]  ;;  %v830_v60 = vld [vmem:[%s1649_s8 + $0x10] sm:$0xff] }
  0x1a   :  { %v828_v58 = vld [vmem:[%s1649_s8] sm:$0xff]  ;;  %v829_v59 = vld [vmem:[%s1649_s8 + $0x8] sm:$0xff]  ;;  %v831_v61 = vld [vmem:[%s1649_s8 + $0x18] sm:$0xff] }
  0x1b   :  { %v913_v62 = vld [vmem:[%s1650_s9] sm:$0xff]  ;;  %v914_v1 = vld [vmem:[%s1650_s9 + $0x8] sm:$0xff]  ;;  %v915_v3 = vld [vmem:[%s1650_s9 + $0x10] sm:$0xff] }
  0x1c   :  { %v832_v2 = vld [vmem:[%s1649_s8 + $0x20] sm:$0xff]  ;;  %v916_v6 = vld [vmem:[%s1650_s9 + $0x18] sm:$0xff] }
  0x1d   :  { %90 = vperm.xlu0 %1183, %v64_v19   ;;  %75 = vperm.xlu1 %1184, %v61_v20   ;;  %v917_v7 = vld [vmem:[%s1650_s9 + $0x20] sm:$0xff] }
  0x1e   :  { %v964_v8 = vld [vmem:[#allocation2] sm:$0x1] }
  0x1f   :  { %80 = vperm.xlu2 %1185, %v62_v21  }
  0x25   :  { %372 = vperm.xlu0 %1183, %v296_v22   ;;  %377 = vperm.xlu1 %1184, %v297_v23  }
  0x27   :  { %362 = vperm.xlu2 %1185, %v294_v24  }
  0x29   :  { %1027 = vmatmul.msk.bf16.gmra.mxu0 %vm184_vm1, %v1144_v25 }
  0x2d   :  { %367 = vperm.xlu0 %1183, %v295_v26   ;;  %352 = vperm.xlu1 %1184, %v292_v27  }
  0x2f   :  { %357 = vperm.xlu2 %1185, %v293_v28  }
  0x35   :  { %342 = vperm.xlu0 %1183, %v290_v29   ;;  %347 = vperm.xlu1 %1184, %v291_v30  }
  0x37   :  { %332 = vperm.xlu2 %1185, %v288_v31  }
  0x39   :  { %1028 = vmatmul.msk.bf16.gmra.mxu0 %vm184_vm1, %v1145_v32 }
  0x3d   :  { %337 = vperm.xlu0 %1183, %v289_v33   ;;  %322 = vperm.xlu1 %1184, %v286_v34  }
  0x3f   :  { %327 = vperm.xlu2 %1185, %v287_v35  }
  0x45   :  { %312 = vperm.xlu0 %1183, %v284_v36   ;;  %317 = vperm.xlu1 %1184, %v285_v37  }
  0x47   :  { %302 = vperm.xlu2 %1185, %v282_v38  }
  0x49   :  { %1029 = vmatmul.msk.bf16.gmra.mxu0 %vm184_vm1, %v1146_v39 }
  0x4d   :  { %307 = vperm.xlu0 %1183, %v283_v40   ;;  %382 = vperm.xlu1 %1184, %v298_v41  }
  0x4f   :  { %387 = vperm.xlu2 %1185, %v299_v42  }
  0x55   :  { %632 = vperm.xlu0 %1183, %v569_v43   ;;  %622 = vperm.xlu1 %1184, %v567_v44  }
  0x57   :  { %627 = vperm.xlu2 %1185, %v568_v45  }
  0x59   :  { %1030 = vmatmul.msk.bf16.gmra.mxu0 %vm184_vm1, %v1147_v46 }
  0x5d   :  { %612 = vperm.xlu0 %1183, %v565_v47   ;;  %617 = vperm.xlu1 %1184, %v566_v48  }
  0x5f   :  { %602 = vperm.xlu2 %1185, %v563_v49  }
  0x61   :  { %v106_v0 = vpop.permute.xlu2 %105 }
  0x65   :  { %607 = vperm.xlu0 %1183, %v564_v50   ;;  %592 = vperm.xlu1 %1184, %v561_v51  }
  0x67   :  { %597 = vperm.xlu2 %1185, %v562_v52  }
  0x69   :  { %1031 = vmatmul.msk.bf16.gmra.mxu0 %vm184_vm1, %v1148_v53  ;;  %v111_v5 = vpop.permute.xlu2 %110 }
  0x6d   :  { %582 = vperm.xlu0 %1183, %v559_v54   ;;  %587 = vperm.xlu1 %1184, %v560_v55  }
  0x6f   :  { %572 = vperm.xlu2 %1185, %v557_v56  }
  0x71   :  { %v86_v11 = vpop.permute.xlu2 %85 }
  0x75   :  { %577 = vperm.xlu0 %1183, %v558_v57   ;;  %835 = vperm.xlu1 %1184, %v828_v58  }
  0x77   :  { %840 = vperm.xlu2 %1185, %v829_v59   ;;  %v116_v63 = vpop.permute.xlu1 %115  ;;  %v126_v9 = vpop.permute.xlu0 %125  ;;  %v1152_v59 = vld [vmem:[%s1644_s3] sm:$0xff] }
  0x79   :  { %v81_v16 = vpop.permute.xlu2 %80 }
  0x7d   :  { %845 = vperm.xlu0 %1183, %v830_v60   ;;  %850 = vperm.xlu1 %1184, %v831_v61   ;;  %v1160_v60 = vld [vmem:[%s1644_s3 + $0x40] sm:$0xff]  ;;  %v1153_v61 = vld [vmem:[%s1644_s3 + $0x8] sm:$0xff] }
  0x7f   :  { %920 = vperm.xlu2 %1185, %v913_v62   ;;  %v121_v4 = vpop.permute.xlu1 %120  ;;  %v131_v13 = vpop.permute.xlu0 %130  ;;  %v1154_v62 = vld [vmem:[%s1644_s3 + $0x10] sm:$0xff] }
  0x85   :  { %925 = vperm.xlu0 %1183, %v914_v1   ;;  %855 = vperm.xlu1 %1184, %v832_v2   ;;  %v1157_v1 = vld [vmem:[%s1644_s3 + $0x28] sm:$0xff] }
  0x87   :  { %930 = vperm.xlu2 %1185, %v915_v3   ;;  %v101_v10 = vpop.permute.xlu1 %100  ;;  %v96_v22 = vpop.permute.xlu0 %95 }
  0x8d   :  { %935 = vperm.xlu0 %1183, %v916_v6   ;;  %940 = vperm.xlu1 %1184, %v917_v7  }
  0x8f   :  { %967 = vperm.xlu2 %1185, %v964_v8   ;;  %v76_v14 = vpop.permute.xlu1 %75  ;;  %v91_v25 = vpop.permute.xlu0 %90 }
  0x96   :  { %v216_v12 = vpop.f32.mrf.mxu0 }
  0x97   :  { %v217_v15 = vadd.f32 %v216_v12, %v76_v14  ;;  %v1500_v2 = vpop.permute.xlu0 %372  ;;  %v1502_v3 = vpop.permute.xlu1 %377 }
  0x99   :  { %v246_v19 = vmax.f32 %v217_v15, 0.0 }
  0x9e   :  { %v218_v17 = vpop.f32.mrf.mxu0 }
  0x9f   :  { %v219_v18 = vadd.f32 %v218_v17, %v81_v16  ;;  %v1509_v6 = vpop.permute.xlu0 %367  ;;  %v1512_v7 = vpop.permute.xlu1 %352 }
  0xa1   :  { %v247_v20 = vmax.f32 %v219_v18, 0.0 }
  0xa3   :  { %v276_v21 = vpack.c.bf16 %v247_v20, %v246_v19 }
  0xa6   :  { %v221_v23 = vpop.f32.mrf.mxu0 }
  0xa7   :  { %v222_v24 = vadd.f32 %v221_v23, %v86_v11  ;;  %v1159_v11 = vld [vmem:[%s1644_s3 + $0x38] sm:$0xff] }
  0xa9   :  { %v248_v28 = vmax.f32 %v222_v24, 0.0 }
  0xae   :  { %v223_v26 = vpop.f32.mrf.mxu0 }
  0xaf   :  { %v224_v27 = vadd.f32 %v223_v26, %v91_v25 }
  0xb1   :  { %v249_v29 = vmax.f32 %v224_v27, 0.0 }
  0xb3   :  { %v277_v30 = vpack.c.bf16 %v249_v29, %v248_v28 }
  0xb6   :  { %v226_v31 = vpop.f32.mrf.mxu0 }
  0xb7   :  { %v227_v53 = vadd.f32 %v226_v31, %v96_v22 }
  0xb9   :  { %v250_v57 = vmax.f32 %v227_v53, 0.0 }
  0xbe   :  { %v228_v32 = vpop.f32.mrf.mxu0 }
  0xbf   :  { %v229_v50 = vadd.f32 %v228_v32, %v101_v10  ;;  %v1518_v10 = vpop.permute.xlu1 %347 }
  0xc1   :  { %v251_v55 = vmax.f32 %v229_v50, 0.0 }
  0xc3   :  { %v278_v58 = vpack.c.bf16 %v251_v55, %v250_v57 }
  0xc6   :  { %v231_v33 = vpop.f32.mrf.mxu0 }
  0xc7   :  { %v232_v48 = vadd.f32 %v231_v33, %v106_v0  ;;  %v1156_v0 = vld [vmem:[%s1644_s3 + $0x20] sm:$0xff]  ;;  %v323_v14 = vpop.permute.xlu1 %322 }
  0xc9   :  { %v252_v54 = vmax.f32 %v232_v48, 0.0 }
  0xce   :  { %v233_v34 = vpop.f32.mrf.mxu0 }
  0xcf   :  { %v234_v45 = vadd.f32 %v233_v34, %v111_v5  ;;  %v1158_v5 = vld [vmem:[%s1644_s3 + $0x30] sm:$0xff]  ;;  %v318_v18 = vpop.permute.xlu1 %317 }
  0xd1   :  { %v253_v51 = vmax.f32 %v234_v45, 0.0 }
  0xd3   :  { %v279_v56 = vpack.c.bf16 %v253_v51, %v252_v54 }
  0xd6   :  { %v236_v35 = vpop.f32.mrf.mxu0 }
  0xd7   :  { %v237_v42 = vadd.f32 %v236_v35, %v116_v63  ;;  %v1155_v63 = vld [vmem:[%s1644_s3 + $0x18] sm:$0xff]  ;;  %v383_v27 = vpop.permute.xlu1 %382 }
  0xd9   :  { %v254_v49 = vmax.f32 %v237_v42, 0.0 }
  0xde   :  { %v238_v36 = vpop.f32.mrf.mxu0 }
  0xdf   :  { %v239_v40 = vadd.f32 %v238_v36, %v121_v4  ;;  %v1504_v4 = vpop.permute.xlu2 %362 }
  0xe1   :  { %v255_v46 = vmax.f32 %v239_v40, 0.0 }
  0xe3   :  { %v280_v52 = vpack.c.bf16 %v255_v46, %v254_v49 }
  0xe6   :  { %v241_v37 = vpop.f32.mrf.mxu0 }
  0xe7   :  { %v242_v38 = vadd.f32 %v241_v37, %v126_v9  ;;  %v1514_v8 = vpop.permute.xlu2 %357  ;;  %v1516_v9 = vpop.permute.xlu0 %342 }
  0xe9   :  { %v256_v43 = vmax.f32 %v242_v38, 0.0 }
  0xee   :  { %v243_v39 = vpop.f32.mrf.mxu0 }
  0xef   :  { %v244_v41 = vadd.f32 %v243_v39, %v131_v13  ;;  %v333_v12 = vpop.permute.xlu2 %332  ;;  %v338_v13 = vpop.permute.xlu0 %337 }
  0xf1   :  { %v257_v44 = vmax.f32 %v244_v41, 0.0 }
  0xf3   :  { %v281_v47 = vpack.c.bf16 %v257_v44, %v256_v43 }
  0xf5   :  { %465 = vmatpush.bf16.msra.mxu1 %v281_v47  ;;  %1175 = vmatpush.bf16.msra.mxu3 %v281_v47 }
  0xf7   :  { %v328_v15 = vpop.permute.xlu2 %327  ;;  %v313_v16 = vpop.permute.xlu0 %312 }
  0xf9   :  { %466 = vmatpush.bf16.msra.mxu1 %v280_v52  ;;  %1176 = vmatpush.bf16.msra.mxu3 %v280_v52 }
  0xfd   :  { %467 = vmatpush.bf16.msra.mxu1 %v279_v56  ;;  %1177 = vmatpush.bf16.msra.mxu3 %v279_v56 }
  0xff   :  { %v303_v19 = vpop.permute.xlu2 %302  ;;  %v308_v22 = vpop.permute.xlu0 %307 }
 0x101   :  { %468 = vmatpush.bf16.msra.mxu1 %v278_v58  ;;  %1178 = vmatpush.bf16.msra.mxu3 %v278_v58 }
 0x105   :  { %469 = vmatpush.bf16.msra.mxu1 %v277_v30  ;;  %1179 = vmatpush.bf16.msra.mxu3 %v277_v30 }
 0x107   :  { %v388_v30 = vpop.permute.xlu2 %387 }
 0x109   :  { %470 = vmatpush.bf16.msra.mxu1 %v276_v21  ;;  %1180 = vmatpush.bf16.msra.mxu3 %v276_v21 }
 0x10c   :  { %1068 = vmatmul.msk.bf16.vlgmr.msra.gmra.mxu1 %vm435_vm2, %v1152_v59  ;;  %1076 = vmatmul.msk.bf16.vlgmr.msra.gmra.mxu3 %vm435_vm2, %v1160_v60 }
 0x11c   :  { %1069 = vmatmul.msk.bf16.gmra.mxu1 %vm435_vm2, %v1153_v61 }
 0x12c   :  { %1070 = vmatmul.msk.bf16.gmra.mxu1 %vm435_vm2, %v1154_v62 }
 0x13c   :  { %1071 = vmatmul.msk.bf16.gmra.mxu1 %vm435_vm2, %v1155_v63 }
 0x14c   :  { %1072 = vmatmul.msk.bf16.gmra.mxu1 %vm435_vm2, %v1156_v0  ;;  %v1161_v0 = vld [vmem:[%s1646_s5 + $0x4] sm:$0xf] }
 0x15c   :  { %1073 = vmatmul.msk.bf16.gmra.mxu1 %vm435_vm2, %v1157_v1  ;;  %v1081_v1 = vld [vmem:[%s1646_s5 + $0x8] sm:$0xf0] }
 0x16c   :  { %1074 = vmatmul.msk.bf16.gmra.mxu1 %vm435_vm2, %v1158_v5  ;;  %v1084_v5 = vor.u32 %v1161_v0, %v1081_v1  ;;  %v1619_v0 = vpop.permute.xlu2 %627 }
 0x17c   :  { %1075 = vmatmul.msk.bf16.gmra.mxu1 %vm435_vm2, %v1159_v11 }
 0x189   :  { %v472_v17 = vpop.f32.mrf.mxu1 }
 0x18a   :  { %v473_v21 = vadd.f32 %v472_v17, %v303_v19 }
 0x18c   :  { %v517_v25 = vmax.f32 %v473_v21, 0.0 }
 0x18f   :  { %v512_v20 = vpop.f32.mrf.mxu3 }
 0x190   :  { %v513_v28 = vadd.f32 %v512_v20, %v383_v27 }
 0x191   :  { %v474_v23 = vpop.f32.mrf.mxu1 }
 0x192   :  { %v475_v24 = vadd.f32 %v474_v23, %v308_v22  ;;  %v533_v34 = vmax.f32 %v513_v28, 0.0  ;;  %v1165_v28 = vld [vmem:[%s1646_s5 + $0x24] sm:$0xf] }
 0x194   :  { %v518_v26 = vmax.f32 %v475_v24, 0.0 }
 0x196   :  { %v1524_v29 = vpack.c.bf16 %v518_v26, %v517_v25 }
 0x197   :  { %v514_v31 = vpop.f32.mrf.mxu3 }
 0x198   :  { %v515_v32 = vadd.f32 %v514_v31, %v388_v30  ;;  %v1079_v31 = vld [vmem:[%s1646_s5] sm:$0xf] }
 0x199   :  { %v477_v33 = vpop.f32.mrf.mxu1 }
 0x19a   :  { %v534_v35 = vmax.f32 %v515_v32, 0.0  ;;  %v478_v37 = vadd.f32 %v477_v33, %v313_v16  ;;  %v1162_v32 = vld [vmem:[%s1646_s5 + $0x4] sm:$0xf0] }
 0x19b   :  { %v1080_v33 = vor.u32 %v1162_v32, %v1079_v31 }
 0x19c   :  { %v556_v36 = vpack.c.bf16 %v534_v35, %v533_v34  ;;  %v519_v40 = vmax.f32 %v478_v37, 0.0  ;;  %v1167_v34 = vld [vmem:[%s1646_s5 + $0x34] sm:$0xf]  ;;  %v1105_v35 = vld [vmem:[%s1646_s5 + $0x38] sm:$0xf0] }
 0x19d   :  { %v1087_v37 = vld [vmem:[%s1646_s5 + $0x10] sm:$0xf] }
 0x19e   :  { %767 = vmatpush.bf16.msrb.mxu3 %v556_v36  ;;  %v1108_v36 = vor.u32 %v1167_v34, %v1105_v35 }
 0x1a1   :  { %v479_v38 = vpop.f32.mrf.mxu1  ;;  %1125 = vmatmul.msk.bf16.vlgmr.msrb.gmra.mxu3 %vm695_vm3, %v1084_v5 }
 0x1a2   :  { %v480_v39 = vadd.f32 %v479_v38, %v318_v18  ;;  %v1164_v38 = vld [vmem:[%s1646_s5 + $0x14] sm:$0xf0] }
 0x1a4   :  { %v520_v41 = vmax.f32 %v480_v39, 0.0  ;;  %v1169_v39 = vld [vmem:[%s1646_s5 + $0x44] sm:$0xf] }
 0x1a6   :  { %v549_v42 = vpack.c.bf16 %v520_v41, %v519_v40  ;;  %v1113_v40 = vld [vmem:[%s1646_s5 + $0x48] sm:$0xf0] }
 0x1a7   :  { %v1116_v41 = vor.u32 %v1169_v39, %v1113_v40 }
 0x1a9   :  { %v482_v43 = vpop.f32.mrf.mxu1 }
 0x1aa   :  { %v483_v44 = vadd.f32 %v482_v43, %v323_v14  ;;  %v1166_v43 = vld [vmem:[%s1646_s5 + $0x24] sm:$0xf0] }
 0x1ac   :  { %v521_v47 = vmax.f32 %v483_v44, 0.0 }
 0x1b1   :  { %v484_v45 = vpop.f32.mrf.mxu1 }
 0x1b2   :  { %v485_v46 = vadd.f32 %v484_v45, %v328_v15  ;;  %v1171_v45 = vld [vmem:[%s1646_s5 + $0x54] sm:$0xf] }
 0x1b4   :  { %v522_v48 = vmax.f32 %v485_v46, 0.0  ;;  %v1121_v46 = vld [vmem:[%s1646_s5 + $0x58] sm:$0xf0] }
 0x1b6   :  { %v550_v49 = vpack.c.bf16 %v522_v48, %v521_v47  ;;  %v1124_v47 = vor.u32 %v1171_v45, %v1121_v46  ;;  %v1103_v48 = vld [vmem:[%s1646_s5 + $0x30] sm:$0xf] }
 0x1b9   :  { %v487_v50 = vpop.f32.mrf.mxu1 }
 0x1ba   :  { %v488_v51 = vadd.f32 %v487_v50, %v333_v12 }
 0x1bc   :  { %v523_v54 = vmax.f32 %v488_v51, 0.0  ;;  %v547_v51 = vld [vmem:[%s1646_s5 + $0x60] sm:$0x33] }
 0x1c1   :  { %v489_v52 = vpop.f32.mrf.mxu1 }
 0x1c2   :  { %v490_v53 = vadd.f32 %v489_v52, %v338_v13  ;;  %v673_v52 = vunpack.c.h.b16 %v547_v51 }
 0x1c4   :  { %v524_v55 = vmax.f32 %v490_v53, 0.0  ;;  %v687_v53 = vpack.c.b16 %v673_v52, %v673_v52 }
 0x1c6   :  { %v551_v56 = vpack.c.bf16 %v524_v55, %v523_v54  ;;  %v1111_v54 = vld [vmem:[%s1646_s5 + $0x40] sm:$0xf]  ;;  %v1170_v55 = vld [vmem:[%s1646_s5 + $0x44] sm:$0xf0] }
 0x1c9   :  { %v492_v57 = vpop.f32.mrf.mxu1 }
 0x1d1   :  { %v494_v58 = vpop.f32.mrf.mxu1 }
 0x1d9   :  { %v497_v59 = vpop.f32.mrf.mxu1 }
 0x1da   :  { %v498_v21 = vadd.f32 %v497_v59, %v1512_v7 }
 0x1e1   :  { %v499_v60 = vpop.f32.mrf.mxu1 }
 0x1e2   :  { %v500_v18 = vadd.f32 %v499_v60, %v1514_v8  ;;  %v527_v8 = vmax.f32 %v498_v21, 0.0  ;;  %v672_v60 = vunpack.c.l.b16 %v547_v51 }
 0x1e4   :  { %v528_v23 = vmax.f32 %v500_v18, 0.0 }
 0x1e6   :  { %v553_v26 = vpack.c.bf16 %v528_v23, %v527_v8 }
 0x1e9   :  { %v502_v61 = vpop.f32.mrf.mxu1 }
 0x1ea   :  { %v503_v15 = vadd.f32 %v502_v61, %v1504_v4  ;;  %v1089_v4 = vld [vmem:[%s1646_s5 + $0x18] sm:$0xf0]  ;;  %v686_v61 = vpack.c.b16 %v672_v60, %v672_v60 }
 0x1ec   :  { %v529_v22 = vmax.f32 %v503_v15, 0.0 }
 0x1f1   :  { %v504_v62 = vpop.f32.mrf.mxu1 }
 0x1f2   :  { %v505_v13 = vadd.f32 %v504_v62, %v1509_v6  ;;  %v493_v6 = vadd.f32 %v492_v57, %v1516_v9  ;;  %v1097_v9 = vld [vmem:[%s1646_s5 + $0x28] sm:$0xf0]  ;;  %v1119_v57 = vld [vmem:[%s1646_s5 + $0x50] sm:$0xf] }
 0x1f3   :  { %v1100_v30 = vor.u32 %v1165_v28, %v1097_v9 }
 0x1f4   :  { %v530_v19 = vmax.f32 %v505_v13, 0.0  ;;  %v525_v27 = vmax.f32 %v493_v6, 0.0 }
 0x1f6   :  { %v554_v24 = vpack.c.bf16 %v530_v19, %v529_v22 }
 0x1f9   :  { %v507_v63 = vpop.f32.mrf.mxu1 }
 0x1fa   :  { %v508_v11 = vadd.f32 %v507_v63, %v1500_v2  ;;  %v495_v2 = vadd.f32 %v494_v58, %v1518_v10  ;;  %v1172_v58 = vld [vmem:[%s1646_s5 + $0x54] sm:$0xf0]  ;;  %v1617_v63 = vpop.permute.xlu0 %632 }
 0x1fb   :  { %v1120_v59 = vor.u32 %v1172_v58, %v1119_v57 }
 0x1fc   :  { %v531_v16 = vmax.f32 %v508_v11, 0.0  ;;  %v526_v7 = vmax.f32 %v495_v2, 0.0 }
 0x1fe   :  { %v552_v10 = vpack.c.bf16 %v526_v7, %v525_v27 }
 0x201   :  { %v509_v12 = vpop.f32.mrf.mxu1 }
 0x202   :  { %v510_v14 = vadd.f32 %v509_v12, %v1502_v3  ;;  %v1163_v3 = vld [vmem:[%s1646_s5 + $0x14] sm:$0xf]  ;;  %v613_v5 = vpop.permute.xlu0 %612  ;;  %v603_v12 = vpop.permute.xlu2 %602 }
 0x203   :  { %v1092_v25 = vor.u32 %v1163_v3, %v1089_v4 }
 0x204   :  { %v532_v17 = vmax.f32 %v510_v14, 0.0 }
 0x205   :  { %1126 = vmatmul.msk.bf16.gmra.mxu3 %vm695_vm3, %v1092_v25 }
 0x206   :  { %v555_v20 = vpack.c.bf16 %v532_v17, %v531_v16  ;;  %v1621_v16 = vpop.permute.xlu1 %622 }
 0x208   :  { %717 = vmatpush.bf16.msra.mxu2 %v555_v20 }
 0x20a   :  { %v608_v14 = vpop.permute.xlu0 %607  ;;  %v598_v15 = vpop.permute.xlu2 %597 }
 0x20c   :  { %718 = vmatpush.bf16.msra.mxu2 %v554_v24 }
 0x20e   :  { %v618_v23 = vpop.permute.xlu1 %617 }
 0x210   :  { %719 = vmatpush.bf16.msra.mxu2 %v553_v26 }
 0x212   :  { %v583_v18 = vpop.permute.xlu0 %582  ;;  %v573_v19 = vpop.permute.xlu2 %572 }
 0x214   :  { %720 = vmatpush.bf16.msra.mxu2 %v552_v10 }
 0x215   :  { %1127 = vmatmul.msk.bf16.gmra.mxu3 %vm695_vm3, %v1100_v30 }
 0x216   :  { %v593_v26 = vpop.permute.xlu1 %592 }
 0x218   :  { %721 = vmatpush.bf16.msra.mxu2 %v551_v56  ;;  %v1112_v56 = vor.u32 %v1170_v55, %v1111_v54 }
 0x21a   :  { %v578_v24 = vpop.permute.xlu0 %577 }
 0x21c   :  { %722 = vmatpush.bf16.msra.mxu2 %v550_v49  ;;  %v1168_v49 = vld [vmem:[%s1646_s5 + $0x34] sm:$0xf0] }
 0x21d   :  { %v1104_v50 = vor.u32 %v1168_v49, %v1103_v48 }
 0x21e   :  { %v588_v31 = vpop.permute.xlu1 %587 }
 0x220   :  { %723 = vmatpush.bf16.msra.mxu2 %v549_v42  ;;  %v1095_v42 = vld [vmem:[%s1646_s5 + $0x20] sm:$0xf] }
 0x221   :  { %v1096_v44 = vor.u32 %v1166_v43, %v1095_v42 }
 0x224   :  { %724 = vmatpush.bf16.msra.mxu2 %v1524_v29  ;;  %v1088_v29 = vor.u32 %v1164_v38, %v1087_v37  ;;  %v769_v62 = vpop.f32.mrf.mxu3 }
 0x225   :  { %1128 = vmatmul.msk.bf16.gmra.mxu3 %vm695_vm3, %v1108_v36 }
 0x227   :  { %725 = vmatmul.bf16.vlgmr.msra.gmra.mxu2 %v1080_v33 }
 0x22c   :  { %v771_v1 = vpop.f32.mrf.mxu3 }
 0x235   :  { %1129 = vmatmul.msk.bf16.gmra.mxu3 %vm695_vm3, %v1116_v41 }
 0x237   :  { %730 = vmatmul.bf16.gmra.mxu2 %v1088_v29 }
 0x245   :  { %1130 = vmatmul.msk.bf16.gmra.mxu3 %vm695_vm3, %v1124_v47 }
 0x247   :  { %735 = vmatmul.bf16.gmra.mxu2 %v1096_v44 }
 0x255   :  { %1131 = vmatmul.msk.bf16.gmra.mxu3 %vm695_vm3, %v687_v53 }
 0x257   :  { %740 = vmatmul.bf16.gmra.mxu2 %v1104_v50 }
 0x267   :  { %745 = vmatmul.bf16.gmra.mxu2 %v1112_v56 }
 0x277   :  { %750 = vmatmul.bf16.gmra.mxu2 %v1120_v59 }
 0x287   :  { %755 = vmatmul.bf16.gmra.mxu2 %v686_v61 }
 0x288   :  { %v774_v11 = vpop.f32.mrf.mxu3 }
 0x290   :  { %v776_v13 = vpop.f32.mrf.mxu3 }
 0x298   :  { %v779_v17 = vpop.f32.mrf.mxu3 }
 0x2a0   :  { %v781_v22 = vpop.f32.mrf.mxu3 }
 0x2a8   :  { %v784_v6 = vpop.f32.mrf.mxu3 }
 0x2aa   :  { %v726_v20 = vpop.f32.mrf.mxu2 }
 0x2ab   :  { %v727_v21 = vadd.f32 %v726_v20, %v573_v19 }
 0x2ad   :  { %v770_v2 = vadd.f32 %v769_v62, %v727_v21 }
 0x2af   :  { %v803_v25 = vmax.f32 %v770_v2, 0.0 }
 0x2b0   :  { %v786_v9 = vpop.f32.mrf.mxu3 }
 0x2b2   :  { %v728_v3 = vpop.f32.mrf.mxu2 }
 0x2b3   :  { %v729_v4 = vadd.f32 %v728_v3, %v578_v24 }
 0x2b5   :  { %v772_v8 = vadd.f32 %v771_v1, %v729_v4 }
 0x2b7   :  { %v804_v7 = vmax.f32 %v772_v8, 0.0 }
 0x2b8   :  { %v789_v34 = vpop.f32.mrf.mxu3 }
 0x2b9   :  { %v1623_v27 = vpack.c.bf16 %v804_v7, %v803_v25 }
 0x2ba   :  { %v731_v10 = vpop.f32.mrf.mxu2 }
 0x2bb   :  { %v732_v28 = vadd.f32 %v731_v10, %v583_v18 }
 0x2bd   :  { %v775_v30 = vadd.f32 %v774_v11, %v732_v28 }
 0x2bf   :  { %v805_v36 = vmax.f32 %v775_v30, 0.0  ;;  %v836_v30 = vpop.permute.xlu1 %835 }
 0x2c0   :  { %v791_v40 = vpop.f32.mrf.mxu3 }
 0x2c2   :  { %v733_v32 = vpop.f32.mrf.mxu2 }
 0x2c3   :  { %v734_v33 = vadd.f32 %v733_v32, %v588_v31  ;;  %v841_v31 = vpop.permute.xlu2 %840 }
 0x2c5   :  { %v777_v35 = vadd.f32 %v776_v13, %v734_v33  ;;  %v846_v33 = vpop.permute.xlu0 %845 }
 0x2c7   :  { %v806_v37 = vmax.f32 %v777_v35, 0.0 }
 0x2c8   :  { %v794_v44 = vpop.f32.mrf.mxu3 }
 0x2c9   :  { %v822_v38 = vpack.c.bf16 %v806_v37, %v805_v36 }
 0x2ca   :  { %v736_v29 = vpop.f32.mrf.mxu2 }
 0x2cb   :  { %v737_v39 = vadd.f32 %v736_v29, %v593_v26  ;;  %v921_v35 = vpop.permute.xlu2 %920 }
 0x2cd   :  { %v780_v41 = vadd.f32 %v779_v17, %v737_v39  ;;  %v926_v37 = vpop.permute.xlu0 %925 }
 0x2cf   :  { %v807_v46 = vmax.f32 %v780_v41, 0.0 }
 0x2d0   :  { %v796_v50 = vpop.f32.mrf.mxu3 }
 0x2d2   :  { %v738_v42 = vpop.f32.mrf.mxu2 }
 0x2d3   :  { %v739_v43 = vadd.f32 %v738_v42, %v598_v15 }
 0x2d5   :  { %v782_v45 = vadd.f32 %v781_v22, %v739_v43 }
 0x2d7   :  { %v808_v47 = vmax.f32 %v782_v45, 0.0 }
 0x2d8   :  { %v799_v55 = vpop.f32.mrf.mxu3 }
 0x2d9   :  { %v823_v48 = vpack.c.bf16 %v808_v47, %v807_v46  ;;  %v931_v47 = vpop.permute.xlu2 %930 }
 0x2da   :  { %v741_v49 = vpop.f32.mrf.mxu2 }
 0x2db   :  { %v742_v51 = vadd.f32 %v741_v49, %v603_v12 }
 0x2dd   :  { %v785_v53 = vadd.f32 %v784_v6, %v742_v51 }
 0x2df   :  { %v809_v57 = vmax.f32 %v785_v53, 0.0 }
 0x2e0   :  { %v801_v61 = vpop.f32.mrf.mxu3 }
 0x2e2   :  { %v743_v52 = vpop.f32.mrf.mxu2 }
 0x2e3   :  { %v744_v54 = vadd.f32 %v743_v52, %v608_v14 }
 0x2e5   :  { %v787_v56 = vadd.f32 %v786_v9, %v744_v54 }
 0x2e7   :  { %v810_v58 = vmax.f32 %v787_v56, 0.0 }
 0x2e9   :  { %v824_v59 = vpack.c.bf16 %v810_v58, %v809_v57 }
 0x2ea   :  { %v746_v60 = vpop.f32.mrf.mxu2 }
 0x2eb   :  { %v747_v62 = vadd.f32 %v746_v60, %v613_v5 }
 0x2ed   :  { %v790_v11 = vadd.f32 %v789_v34, %v747_v62 }
 0x2ef   :  { %v811_v17 = vmax.f32 %v790_v11, 0.0 }
 0x2f2   :  { %v748_v1 = vpop.f32.mrf.mxu2 }
 0x2f3   :  { %v749_v13 = vadd.f32 %v748_v1, %v618_v23 }
 0x2f5   :  { %v792_v15 = vadd.f32 %v791_v40, %v749_v13 }
 0x2f7   :  { %v812_v18 = vmax.f32 %v792_v15, 0.0 }
 0x2f9   :  { %v825_v19 = vpack.c.bf16 %v812_v18, %v811_v17 }
 0x2fa   :  { %v751_v20 = vpop.f32.mrf.mxu2 }
 0x2fb   :  { %v752_v2 = vadd.f32 %v751_v20, %v1621_v16  ;;  %v820_v16 = vld [vmem:[%s1648_s7 + $0x10] sm:$0xf] }
 0x2fc   :  { %v867_v10 = vunpack.c.l.b16 %v820_v16 }
 0x2fd   :  { %v795_v5 = vadd.f32 %v794_v44, %v752_v2 }
 0x2fe   :  { %v870_v28 = vpack.c.b16 %v867_v10, %v867_v10 }
 0x2ff   :  { %v813_v7 = vmax.f32 %v795_v5, 0.0 }
 0x302   :  { %v753_v12 = vpop.f32.mrf.mxu2 }
 0x303   :  { %v754_v21 = vadd.f32 %v753_v12, %v1619_v0  ;;  %v1174_v0 = vld [vmem:[%s1648_s7 + $0x8] sm:$0xff]  ;;  %v968_v12 = vpop.permute.xlu2 %967 }
 0x305   :  { %v797_v3 = vadd.f32 %v796_v50, %v754_v21  ;;  %v936_v50 = vpop.permute.xlu0 %935 }
 0x307   :  { %v814_v23 = vmax.f32 %v797_v3, 0.0 }
 0x309   :  { %v826_v26 = vpack.c.bf16 %v814_v23, %v813_v7 }
 0x30a   :  { %v756_v14 = vpop.f32.mrf.mxu2 }
 0x30b   :  { %v757_v22 = vadd.f32 %v756_v14, %v1617_v63  ;;  %v1173_v63 = vld [vmem:[%s1648_s7] sm:$0xff]  ;;  %s1213_s7 = smov [#allocation3]   ;;  %v970_v14 = vperm.slane %v968_v12, 0 }
 0x30c   :  { %s979_s23 = sshll.u32 %s1213_s7, 4  ;;  %s980_s23 = int_to_ptr.vmem [resolvable:$true] %s979_s23 }
 0x30d   :  { %v800_v24 = vadd.f32 %v799_v55, %v757_v22 }
 0x30f   :  { %v815_v4 = vmax.f32 %v800_v24, 0.0 }
 0x311   :  { %v827_v6 = vpack.c.bf16 %v815_v4, %v815_v4 }
 0x312   :  { %v758_v8 = vpop.f32.mrf.mxu2 }
 0x313   :  { %v883_v25 = vsel %vm881_vm4, %v827_v6, 0 }
 0x314   :  { %886 = vmatpush.bf16.msrb.mxu0 %v883_v25 }
 0x318   :  { %887 = vmatpush.bf16.msrb.mxu0 %v826_v26 }
 0x31c   :  { %888 = vmatpush.bf16.msrb.mxu0 %v825_v19 }
 0x320   :  { %889 = vmatpush.bf16.msrb.mxu0 %v824_v59 }
 0x324   :  { %890 = vmatpush.bf16.msrb.mxu0 %v823_v48 }
 0x328   :  { %891 = vmatpush.bf16.msrb.mxu0 %v822_v38 }
 0x32c   :  { %892 = vmatpush.bf16.msrb.mxu0 %v1623_v27  ;;  %v851_v27 = vpop.permute.xlu1 %850 }
 0x32f   :  { %1140 = vmatmul.msk.bf16.vlgmr.msrb.gmra.mxu0 %vm871_vm5, %v1173_v63 }
 0x334   :  { %v856_v44 = vpop.permute.xlu1 %855 }
 0x33c   :  { %v941_v60 = vpop.permute.xlu1 %940 }
 0x33f   :  { %1141 = vmatmul.msk.bf16.gmra.mxu0 %vm871_vm5, %v1174_v0 }
 0x34f   :  { %1142 = vmatmul.msk.bf16.gmra.mxu0 %vm871_vm5, %v870_v28 }
 0x3ac   :  { %v894_v9 = vpop.f32.mrf.mxu0 }
 0x3ad   :  { %v895_v38 = vadd.f32 %v894_v9, %v836_v30 }
 0x3af   :  { %v908_v41 = vmax.f32 %v895_v38, 0.0 }
 0x3b1   :  { %v943_v48 = vmul.f32 %v921_v35, %v908_v41 }
 0x3b3   :  { %v949_v54 = vsel %vm948_vm6, %v943_v48, 0.0 }
 0x3b4   :  { %v896_v32 = vpop.f32.mrf.mxu0 }
 0x3b5   :  { %v897_v36 = vadd.f32 %v896_v32, %v841_v31 }
 0x3b7   :  { %v909_v39 = vmax.f32 %v897_v36, 0.0 }
 0x3b9   :  { %v944_v45 = vmul.f32 %v926_v37, %v909_v39 }
 0x3bb   :  { %v950_v51 = vsel %vm948_vm6, %v944_v45, 0.0 }
 0x3bc   :  { %v899_v34 = vpop.f32.mrf.mxu0  ;;  %v951_v57 = vadd.f32 %v950_v51, %v949_v54 }
 0x3bd   :  { %v900_v29 = vadd.f32 %v899_v34, %v846_v33 }
 0x3bf   :  { %v910_v42 = vmax.f32 %v900_v29, 0.0 }
 0x3c1   :  { %v945_v49 = vmul.f32 %v931_v47, %v910_v42 }
 0x3c3   :  { %v952_v55 = vsel %vm948_vm6, %v945_v49, 0.0 }
 0x3c4   :  { %v901_v40 = vpop.f32.mrf.mxu0  ;;  %v953_v61 = vadd.f32 %v952_v55, %v951_v57 }
 0x3c5   :  { %v902_v43 = vadd.f32 %v901_v40, %v851_v27 }
 0x3c7   :  { %v911_v46 = vmax.f32 %v902_v43, 0.0 }
 0x3c9   :  { %v946_v52 = vmul.f32 %v936_v50, %v911_v46 }
 0x3cb   :  { %v954_v58 = vsel %vm948_vm6, %v946_v52, 0.0 }
 0x3cc   :  { %v904_v53 = vpop.f32.mrf.mxu0  ;;  %v955_v1 = vadd.f32 %v954_v58, %v953_v61 }
 0x3cd   :  { %v905_v56 = vadd.f32 %v904_v53, %v856_v44 }
 0x3cf   :  { %v912_v59 = vmax.f32 %v905_v56, 0.0 }
 0x3d1   :  { %v947_v62 = vmul.f32 %v941_v60, %v912_v59 }
 0x3d3   :  { %v956_v11 = vsel %vm948_vm6, %v947_v62, 0.0 }
 0x3d4   :  { %v957_v13 = vadd.f32 %v956_v11, %v955_v1  ;;  %v906_v15 = vpop.f32.mrf.mxu0 }
 0x3d6   :  { %v958_v17 = vrot.slane %v957_v13, 4 }
 0x3d8   :  { %v959_v18 = vadd.f32 %v958_v17, %v957_v13 }
 0x3da   :  { %v960_v19 = vrot.slane %v959_v18, 2 }
 0x3dc   :  { %v961_v20 = vadd.f32 %v960_v19, %v959_v18 }
 0x3de   :  { %v962_v21 = vrot.slane %v961_v20, 1 }
 0x3e0   :  { %v963_v22 = vadd.f32 %v962_v21, %v961_v20 }
 0x3e2   :  { %v971_v2 = vadd.f32 %v970_v14, %v963_v22 }
 0x3e4   :  { %973 = vst.msk [vmem:[#allocation3] sm:$0x1] %vm972_vm7, %v971_v2 }
 0x3e5   :  { %984 = dma.vmem_to_hbm [thread:$0]  %s980_s23, 16, %s982_s25, [#allocation4]  }
 0x3e6   :  { %1210 = dma.done.wait [#allocation4], 16  }
 0x3e7   :  { %1211 = vsyncadd [#allocation4], 4294967280 }
 0x3e8   :  { %989 = vsyncpa [#allocation4], 1 }

</bundles_post_ra>
